<compile_context>
chip_gen: v6e
topology: v6e:2x2x1
jax: 0.10.0
libtpu: 0.0.40
codegen_flags: <defaults>
</compile_context>

<pallas_src>
import jax
import jax.numpy as jnp
from jax.experimental import pallas as pl
from jax.experimental.pallas import tpu as pltpu

LANE = 128
SUBLANE = 8


def _round_up(v, m):
    return ((v + m - 1) // m) * m


def mlp_kernel(x_ref, w1_ref, b1_ref, w2_ref, b2_ref, w3_ref, b3_ref, o_ref):
    # Layer 1: (TB, Kp)bf16 @ (Kp, Hp)bf16 -> f32 acc, bias + ReLU in f32
    h1 = jnp.dot(x_ref[...], w1_ref[...], preferred_element_type=jnp.float32)
    h1 = jnp.maximum(h1 + b1_ref[...], 0.0)

    # Layer 2: (TB, Hp) @ (Hp, Hp)
    h2 = jnp.dot(h1.astype(jnp.bfloat16), w2_ref[...],
                 preferred_element_type=jnp.float32)
    h2 = jnp.maximum(h2 + b2_ref[...], 0.0)

    # Output: (TB, Hp) @ (Hp, Np), no activation
    out = jnp.dot(h2.astype(jnp.bfloat16), w3_ref[...],
                  preferred_element_type=jnp.float32)
    o_ref[...] = (out + b3_ref[...]).astype(o_ref.dtype)


def _pad2(a, rows, cols):
    return jnp.pad(a, ((0, rows - a.shape[0]), (0, cols - a.shape[1])))


def mlp_forward(x, w1, b1, w2, b2, w3, b3, *, tb=None):
    """x: [B, 784] f32. Weights stored [in, out] (transposed vs PyTorch),
    biases 1-D. Returns [B, 10] f32."""
    B, K = x.shape
    H = w1.shape[1]
    n_out = w3.shape[1]

    # Lane-dense padded sizes (all last dims multiples of 128).
    Kp = _round_up(K, LANE)       # 784 -> 896
    Hp = _round_up(H, LANE)       # 32  -> 128
    Np = _round_up(n_out, LANE)   # 10  -> 128

    # Batch tile: up to 256 rows per grid step (fills a v6e/v7x MXU pass),
    # but never pad a tiny batch up to a huge tile.
    if tb is None:
        tb = min(256, _round_up(B, SUBLANE))
    tb = max(SUBLANE, _round_up(tb, SUBLANE))
    Bp = _round_up(B, tb)
    grid = (Bp // tb,)

    # Zero-pad once in the wrapper; matmul inputs cast to bf16, biases f32.
    x_p = _pad2(x, Bp, Kp).astype(jnp.bfloat16)
    w1_p = _pad2(w1, Kp, Hp).astype(jnp.bfloat16)
    w2_p = _pad2(w2, Hp, Hp).astype(jnp.bfloat16)
    w3_p = _pad2(w3, Hp, Np).astype(jnp.bfloat16)
    b1_p = _pad2(b1.reshape(1, -1), 1, Hp).astype(jnp.float32)
    b2_p = _pad2(b2.reshape(1, -1), 1, Hp).astype(jnp.float32)
    b3_p = _pad2(b3.reshape(1, -1), 1, Np).astype(jnp.float32)

    # Weights/biases: constant block index -> stay resident in VMEM across
    # all batch grid steps (no re-DMA).
    const = lambda shape: pl.BlockSpec(shape, lambda i: (0, 0))

    out_p = pl.pallas_call(
        mlp_kernel,
        out_shape=jax.ShapeDtypeStruct((Bp, Np), jnp.float32),
        grid=grid,
        in_specs=[
            pl.BlockSpec((tb, Kp), lambda i: (i, 0)),   # x: tiled on batch
            const((Kp, Hp)), const((1, Hp)),            # W1, b1
            const((Hp, Hp)), const((1, Hp)),            # W2, b2
            const((Hp, Np)), const((1, Np)),            # W3, b3
        ],
        out_specs=pl.BlockSpec((tb, Np), lambda i: (i, 0)),
        compiler_params=pltpu.CompilerParams(
            dimension_semantics=("parallel",),          # 2x on v7x megacore
            vmem_limit_bytes=64 * 1024 * 1024,
        ),
    )(x_p, w1_p, b1_p, w2_p, b2_p, w3_p, b3_p)

    return out_p[:B, :n_out]


def init_params(key, n_neurons):
    """Mirrors get_initializer('random_normal'): W ~ N(0, 0.05), b = 0.
    Weights stored as [in, out]."""
    k1, k2, k3 = jax.random.split(key, 3)
    std = 0.05
    w1 = jax.random.normal(k1, (784, n_neurons), jnp.float32) * std
    w2 = jax.random.normal(k2, (n_neurons, n_neurons), jnp.float32) * std
    w3 = jax.random.normal(k3, (n_neurons, 10), jnp.float32) * std
    b1 = jnp.zeros((n_neurons,), jnp.float32)
    b2 = jnp.zeros((n_neurons,), jnp.float32)
    b3 = jnp.zeros((10,), jnp.float32)
    return w1, b1, w2, b2, w3, b3


def ref_forward_bf16(x, w1, b1, w2, b2, w3, b3):
    """Pure-JAX reference with matching precision (bf16 inputs, f32 acc)."""
    bf, f32 = jnp.bfloat16, jnp.float32
    h = jnp.dot(x.astype(bf), w1.astype(bf), preferred_element_type=f32) + b1
    h = jnp.maximum(h, 0.0)
    h = jnp.dot(h.astype(bf), w2.astype(bf), preferred_element_type=f32) + b2
    h = jnp.maximum(h, 0.0)
    return jnp.dot(h.astype(bf), w3.astype(bf), preferred_element_type=f32) + b3


def ref_forward_f32(x, w1, b1, w2, b2, w3, b3):
    h = jnp.maximum(x @ w1 + b1, 0.0)
    h = jnp.maximum(h @ w2 + b2, 0.0)
    return h @ w3 + b3


if __name__ == "__main__":
    key = jax.random.PRNGKey(0)
    k_x, k_x2, k_p = jax.random.split(key, 3)

    n_neurons = 32
    w1, b1, w2, b2, w3, b3 = init_params(k_p, n_neurons)

    # --- small batch (single grid step) ---
    batch = 8
    x = jax.random.normal(k_x, (batch, 784), jnp.float32)
    out = jax.block_until_ready(mlp_forward(x, w1, b1, w2, b2, w3, b3))
    assert out.shape == (batch, 10)

    ref_bf = ref_forward_bf16(x, w1, b1, w2, b2, w3, b3)
    ref_f32 = ref_forward_f32(x, w1, b1, w2, b2, w3, b3)
    assert jnp.allclose(out, ref_bf, atol=1e-3, rtol=1e-3), "mismatch vs bf16 reference"
    assert jnp.allclose(out, ref_f32, atol=5e-2), "mismatch vs f32 reference"

    # --- larger, non-multiple batch exercising the batch grid + tail padding ---
    batch2 = 300
    x2 = jax.random.normal(k_x2, (batch2, 784), jnp.float32)
    out2 = jax.block_until_ready(mlp_forward(x2, w1, b1, w2, b2, w3, b3, tb=128))
    assert out2.shape == (batch2, 10)
    ref2 = ref_forward_bf16(x2, w1, b1, w2, b2, w3, b3)
    assert jnp.allclose(out2, ref2, atol=1e-3, rtol=1e-3), "mismatch on tiled batch"

    print("KERNEL_OK")
</pallas_src>

<mosaic_0001>
module attributes {stable_mosaic.version = 11 : i64} {
  func.func @mlp_kernel(%arg0: i32, %arg1: memref<8x896xbf16, #tpu.memory_space<vmem>>, %arg2: memref<896x128xbf16, #tpu.memory_space<vmem>>, %arg3: memref<1x128xf32, #tpu.memory_space<vmem>>, %arg4: memref<128x128xbf16, #tpu.memory_space<vmem>>, %arg5: memref<1x128xf32, #tpu.memory_space<vmem>>, %arg6: memref<128x128xbf16, #tpu.memory_space<vmem>>, %arg7: memref<1x128xf32, #tpu.memory_space<vmem>>, %arg8: memref<8x128xf32, #tpu.memory_space<vmem>>) attributes {dimension_semantics = [#tpu.dimension_semantics<parallel>], iteration_bounds = array<i64: 1>, scalar_prefetch = 0 : i64, scratch_operands = 0 : i64, tpu.core_type = #tpu.core_type<tc>, window_params = [{transform_indices = @transform_0, window_bounds = array<i64: 8, 896>}, {pipeline_mode = #tpu.pipeline_mode<synchronous>, transform_indices = @transform_1, window_bounds = array<i64: 896, 128>}, {pipeline_mode = #tpu.pipeline_mode<synchronous>, transform_indices = @transform_2, window_bounds = array<i64: 1, 128>}, {pipeline_mode = #tpu.pipeline_mode<synchronous>, transform_indices = @transform_3, window_bounds = array<i64: 128, 128>}, {pipeline_mode = #tpu.pipeline_mode<synchronous>, transform_indices = @transform_4, window_bounds = array<i64: 1, 128>}, {pipeline_mode = #tpu.pipeline_mode<synchronous>, transform_indices = @transform_5, window_bounds = array<i64: 128, 128>}, {pipeline_mode = #tpu.pipeline_mode<synchronous>, transform_indices = @transform_6, window_bounds = array<i64: 1, 128>}, {transform_indices = @transform_7, window_bounds = array<i64: 8, 128>}]} {
    %c0 = arith.constant 0 : index
    %c0_0 = arith.constant 0 : index
    %0 = vector.load %arg1[%c0, %c0_0] : memref<8x896xbf16, #tpu.memory_space<vmem>>, vector<8x896xbf16>
    %c0_1 = arith.constant 0 : index
    %c0_2 = arith.constant 0 : index
    %1 = vector.load %arg2[%c0_1, %c0_2] : memref<896x128xbf16, #tpu.memory_space<vmem>>, vector<896x128xbf16>
    %cst = arith.constant dense<0.000000e+00> : vector<8x128xf32>
    %2 = tpu.matmul %0, %1, %cst {dimension_numbers = #tpu.dot_dimension_numbers<[1], [0], [0], [1], [0, 0, 1, 1], [], []>} : vector<8x896xbf16>, vector<896x128xbf16>, vector<8x128xf32> -> vector<8x128xf32>
    %c0_3 = arith.constant 0 : index
    %c0_4 = arith.constant 0 : index
    %3 = vector.load %arg3[%c0_3, %c0_4] : memref<1x128xf32, #tpu.memory_space<vmem>>, vector<1x128xf32>
    %4 = vector.broadcast %3 : vector<1x128xf32> to vector<8x128xf32>
    %5 = arith.addf %2, %4 : vector<8x128xf32>
    %cst_5 = arith.constant 0.000000e+00 : f32
    %6 = vector.broadcast %cst_5 : f32 to vector<8x128xf32>
    %7 = arith.maximumf %5, %6 : vector<8x128xf32>
    %8 = arith.truncf %7 : vector<8x128xf32> to vector<8x128xbf16>
    %c0_6 = arith.constant 0 : index
    %c0_7 = arith.constant 0 : index
    %9 = vector.load %arg4[%c0_6, %c0_7] : memref<128x128xbf16, #tpu.memory_space<vmem>>, vector<128x128xbf16>
    %cst_8 = arith.constant dense<0.000000e+00> : vector<8x128xf32>
    %10 = tpu.matmul %8, %9, %cst_8 {dimension_numbers = #tpu.dot_dimension_numbers<[1], [0], [0], [1], [0, 0, 1, 1], [], []>} : vector<8x128xbf16>, vector<128x128xbf16>, vector<8x128xf32> -> vector<8x128xf32>
    %c0_9 = arith.constant 0 : index
    %c0_10 = arith.constant 0 : index
    %11 = vector.load %arg5[%c0_9, %c0_10] : memref<1x128xf32, #tpu.memory_space<vmem>>, vector<1x128xf32>
    %12 = vector.broadcast %11 : vector<1x128xf32> to vector<8x128xf32>
    %13 = arith.addf %10, %12 : vector<8x128xf32>
    %cst_11 = arith.constant 0.000000e+00 : f32
    %14 = vector.broadcast %cst_11 : f32 to vector<8x128xf32>
    %15 = arith.maximumf %13, %14 : vector<8x128xf32>
    %16 = arith.truncf %15 : vector<8x128xf32> to vector<8x128xbf16>
    %c0_12 = arith.constant 0 : index
    %c0_13 = arith.constant 0 : index
    %17 = vector.load %arg6[%c0_12, %c0_13] : memref<128x128xbf16, #tpu.memory_space<vmem>>, vector<128x128xbf16>
    %cst_14 = arith.constant dense<0.000000e+00> : vector<8x128xf32>
    %18 = tpu.matmul %16, %17, %cst_14 {dimension_numbers = #tpu.dot_dimension_numbers<[1], [0], [0], [1], [0, 0, 1, 1], [], []>} : vector<8x128xbf16>, vector<128x128xbf16>, vector<8x128xf32> -> vector<8x128xf32>
    %c0_15 = arith.constant 0 : index
    %c0_16 = arith.constant 0 : index
    %19 = vector.load %arg7[%c0_15, %c0_16] : memref<1x128xf32, #tpu.memory_space<vmem>>, vector<1x128xf32>
    %20 = vector.broadcast %19 : vector<1x128xf32> to vector<8x128xf32>
    %21 = arith.addf %18, %20 : vector<8x128xf32>
    %c0_17 = arith.constant 0 : index
    %c0_18 = arith.constant 0 : index
    %22 = vector.load %arg8[%c0_17, %c0_18] : memref<8x128xf32, #tpu.memory_space<vmem>>, vector<8x128xf32>
    tpu.vector_store %arg8[%c0_17, %c0_18], %21 {strides = array<i32>} : memref<8x128xf32, #tpu.memory_space<vmem>>, vector<8x128xf32>,
    return
  }
  func.func @transform_0(%arg0: i32) -> (i32, i32) {
    %c0_i32 = arith.constant 0 : i32
    %c0_i32_0 = arith.constant 0 : i32
    return %arg0, %c0_i32 : i32, i32
  }
  func.func @transform_1(%arg0: i32) -> (i32, i32) {
    %c0_i32 = arith.constant 0 : i32
    %c0_i32_0 = arith.constant 0 : i32
    %c0_i32_1 = arith.constant 0 : i32
    return %c0_i32, %c0_i32_0 : i32, i32
  }
  func.func @transform_2(%arg0: i32) -> (i32, i32) {
    %c0_i32 = arith.constant 0 : i32
    %c0_i32_0 = arith.constant 0 : i32
    %c0_i32_1 = arith.constant 0 : i32
    return %c0_i32, %c0_i32_0 : i32, i32
  }
  func.func @transform_3(%arg0: i32) -> (i32, i32) {
    %c0_i32 = arith.constant 0 : i32
    %c0_i32_0 = arith.constant 0 : i32
    %c0_i32_1 = arith.constant 0 : i32
    return %c0_i32, %c0_i32_0 : i32, i32
  }
  func.func @transform_4(%arg0: i32) -> (i32, i32) {
    %c0_i32 = arith.constant 0 : i32
    %c0_i32_0 = arith.constant 0 : i32
    %c0_i32_1 = arith.constant 0 : i32
    return %c0_i32, %c0_i32_0 : i32, i32
  }
  func.func @transform_5(%arg0: i32) -> (i32, i32) {
    %c0_i32 = arith.constant 0 : i32
    %c0_i32_0 = arith.constant 0 : i32
    %c0_i32_1 = arith.constant 0 : i32
    return %c0_i32, %c0_i32_0 : i32, i32
  }
  func.func @transform_6(%arg0: i32) -> (i32, i32) {
    %c0_i32 = arith.constant 0 : i32
    %c0_i32_0 = arith.constant 0 : i32
    %c0_i32_1 = arith.constant 0 : i32
    return %c0_i32, %c0_i32_0 : i32, i32
  }
  func.func @transform_7(%arg0: i32) -> (i32, i32) {
    %c0_i32 = arith.constant 0 : i32
    %c0_i32_0 = arith.constant 0 : i32
    return %arg0, %c0_i32 : i32, i32
  }
}

</mosaic_0001>

<bundles_post_ra>
// kernel: tpu_custom_call.1
= control target key start
LH: loop header
LB: loop body
LE: loop exit
PB: predicated region body
PF: predicated region fallthrough
CT: control target
= control target key end

     0   :  { %12 = vsyncpa [#allocation3], 0  ;;  %s1512_s0 = inlined_call_operand.hbm [shape: bf16[8,896], index: 0, kind: input, shape index: {}]   ;;  %s1513_s1 = inlined_call_operand.hbm [shape: bf16[896,128], index: 1, kind: input, shape index: {}]   ;;  %s1514_s2 = inlined_call_operand.vmem [shape: f32[1,128], index: 2, kind: input, shape index: {}]   ;;  %s1515_s3 = inlined_call_operand.hbm [shape: bf16[128,128], index: 3, kind: input, shape index: {}]   ;;  %s1516_s4 = inlined_call_operand.vmem [shape: f32[1,128], index: 4, kind: input, shape index: {}]   ;;  %s1517_s5 = inlined_call_operand.hbm [shape: bf16[128,128], index: 5, kind: input, shape index: {}]   ;;  %s1518_s6 = inlined_call_operand.vmem [shape: f32[1,128], index: 6, kind: input, shape index: {}]   ;;  %s1519_s7 = inlined_call_operand.hbm [shape: f32[8,128], index: 7, kind: output, shape index: {}]  }
   0x1   :  { %13 = vsyncpa [#allocation6], 0 }
   0x2   :  { %14 = vsyncpa [#allocation9], 0 }
   0x3   :  { %15 = vsyncpa [#allocation4], 0  ;;  %s1400_s24 = smov [#allocation5]  }
   0x4   :  { %s31_s25 = sshll.u32 %s1400_s24, 4  ;;  %s32_s25 = int_to_ptr.vmem [resolvable:$true] %s31_s25 }
   0x5   :  { %s1300_s26 = scalar_lea.vmem %s32_s25, 7168  ;;  %p1305_p1 = scmp.lt.s32.totalorder %s32_s25, %s32_s25 }
   0x6   :  { %p1301_p0 = scmp.ne.s32.totalorder %s32_s25, %s1300_s26  ;;  %p1306_p2 = scmp.lt.s32.totalorder %s1300_s26, %s1300_s26 }
   0x8   :  { %p1307_p3 = por %p1306_p2, %p1305_p1 }
   0xa   :  { %p1308_p4 = pnand %p1307_p3, %p1301_p0 }
   0xc   :  { %1311 = shalt.err (!%p1308_p4)
}
   0xd   :  { %s1401_s27 = smov 64   ;;  %s1402_s28 = smov 4  }
   0xe   :  { %37 = dma.hbm_to_vmem [thread:$0]  %s1513_s1, 7168, %s32_s25, [#allocation6], %s1401_s27, %s1401_s27, %s1402_s28  }
   0xf   :  { %s1403_s8 = smov [#allocation2]   ;;  %s1404_s10 = smov [#allocation7]  }
  0x10   :  { %s22_s9 = sshll.u32 %s1403_s8, 4  ;;  %s45_s11 = sshll.u32 %s1404_s10, 4  ;;  %s23_s9 = int_to_ptr.vmem [resolvable:$true] %s22_s9  ;;  %s46_s11 = int_to_ptr.vmem [resolvable:$true] %s45_s11 }
  0x11   :  { %s1320_s12 = scalar_lea.vmem %s23_s9, 448  ;;  %p1325_p6 = scmp.lt.s32.totalorder %s23_s9, %s23_s9 }
  0x12   :  { %p1321_p5 = scmp.ne.s32.totalorder %s23_s9, %s1320_s12  ;;  %p1326_p7 = scmp.lt.s32.totalorder %s1320_s12, %s1320_s12 }
  0x14   :  { %p1327_p8 = por %p1326_p7, %p1325_p6 }
  0x16   :  { %p1328_p9 = pnand %p1327_p8, %p1321_p5 }
  0x18   :  { %1331 = shalt.err (!%p1328_p9)
}
  0x19   :  { %25 = dma.hbm_to_vmem [thread:$0]  %s1512_s0, 448, %s23_s9, [#allocation3]  }
  0x1a   :  { %s1340_s15 = scalar_lea.vmem %s46_s11, 1024  ;;  %p1345_p11 = scmp.lt.s32.totalorder %s46_s11, %s46_s11 }
  0x1b   :  { %p1341_p10 = scmp.ne.s32.totalorder %s46_s11, %s1340_s15  ;;  %p1346_p12 = scmp.lt.s32.totalorder %s1340_s15, %s1340_s15 }
  0x1d   :  { %p1347_p13 = por %p1346_p12, %p1345_p11 }
  0x1f   :  { %p1348_p0 = pnand %p1347_p13, %p1341_p10 }
  0x21   :  { %1351 = shalt.err (!%p1348_p0)
}
  0x22   :  { %51 = dma.hbm_to_vmem [thread:$0]  %s1515_s3, 1024, %s46_s11, [#allocation6], %s1401_s27, %s1401_s27, %s1402_s28  }
  0x23   :  { %s1405_s17 = smov [#allocation8]  }
  0x24   :  { %s59_s18 = sshll.u32 %s1405_s17, 4  ;;  %s60_s18 = int_to_ptr.vmem [resolvable:$true] %s59_s18 }
  0x25   :  { %s1360_s19 = scalar_lea.vmem %s60_s18, 1024  ;;  %p1365_p2 = scmp.lt.s32.totalorder %s60_s18, %s60_s18 }
  0x26   :  { %p1361_p1 = scmp.ne.s32.totalorder %s60_s18, %s1360_s19  ;;  %p1366_p3 = scmp.lt.s32.totalorder %s1360_s19, %s1360_s19 }
  0x28   :  { %p1367_p4 = por %p1366_p3, %p1365_p2 }
  0x2a   :  { %p1368_p5 = pnand %p1367_p4, %p1361_p1 }
  0x2c   :  { %1371 = shalt.err (!%p1368_p5)
}
  0x2d   :  { %65 = dma.hbm_to_vmem [thread:$0]  %s1517_s5, 1024, %s60_s18, [#allocation9], %s1401_s27, %s1401_s27, %s1402_s28  }
  0x2e   :  { %1392 = dma.done.wait [#allocation3], 448  }
  0x2f   :  { %1393 = vsyncadd [#allocation3], 4294966848 }
  0x30   :  { %1394 = dma.done.wait [#allocation6], 8192  }
  0x31   :  { %1395 = vsyncadd [#allocation6], 4294959104 }
  0x32   :  { %1396 = dma.done.wait [#allocation9], 1024  }
  0x33   :  { %1397 = vsyncadd [#allocation9], 4294966272  ;;  %v1213_v0 = vld [vmem:[#allocation5 + $0x78] sm:$0xff]   ;;  %v1217_v4 = vld [vmem:[#allocation5 + $0x70] sm:$0xff]   ;;  %v1406_v39 = vmov 0.0   ;;  %vm1407_vm0 = vmmov 0  }
  0x34   :  { %v1214_v1 = vld [vmem:[#allocation5 + $0xf8] sm:$0xff]   ;;  %1051 = vmatprep.subr.bf16.mxu0 %v1213_v0  ;;  %v1218_v5 = vld [vmem:[#allocation5 + $0xf0] sm:$0xff]   ;;  %v1221_v8 = vld [vmem:[#allocation5 + $0x68] sm:$0xff]   ;;  %s1408_s24 = smov [#allocation10]  }
  0x35   :  { %v1215_v2 = vld [vmem:[#allocation5 + $0x38] sm:$0xff]   ;;  %1073 = vmatprep.subr.bf16.mxu1 %v1214_v1  ;;  %v1219_v6 = vld [vmem:[#allocation5 + $0x30] sm:$0xff]   ;;  %v1222_v9 = vld [vmem:[#allocation5 + $0xe8] sm:$0xff]   ;;  %s958_s25 = sshll.u32 %s1408_s24, 4  ;;  %s959_s25 = int_to_ptr.vmem [resolvable:$true] %s958_s25 }
  0x36   :  { %v1216_v3 = vld [vmem:[#allocation5 + $0xb8] sm:$0xff]   ;;  %1052 = vmatpush3.bf16.msra.mxu0 %v1215_v2  ;;  %v1220_v7 = vld [vmem:[#allocation5 + $0xb0] sm:$0xff]   ;;  %v1223_v10 = vld [vmem:[#allocation5 + $0x28] sm:$0xff]   ;;  %p1377_p7 = scmp.lt.s32.totalorder %s959_s25, %s959_s25 }
  0x37   :  { %1074 = vmatpush3.bf16.msra.mxu1 %v1216_v3  ;;  %1053 = vmatprep.subr.bf16.mxu0 %v1217_v4  ;;  %v1224_v11 = vld [vmem:[#allocation5 + $0xa8] sm:$0xff]   ;;  %v1225_v12 = vld [vmem:[#allocation5 + $0x60] sm:$0xff]   ;;  %v1229_v16 = vld [vmem:[#allocation5 + $0x58] sm:$0xff]  }
  0x38   :  { %1075 = vmatprep.subr.bf16.mxu1 %v1218_v5  ;;  %v1226_v13 = vld [vmem:[#allocation5 + $0xe0] sm:$0xff]   ;;  %v1230_v17 = vld [vmem:[#allocation5 + $0xd8] sm:$0xff]   ;;  %v1233_v20 = vld [vmem:[#allocation5 + $0x50] sm:$0xff]  }
  0x39   :  { %v1227_v14 = vld [vmem:[#allocation5 + $0x20] sm:$0xff]   ;;  %v1231_v18 = vld [vmem:[#allocation5 + $0x18] sm:$0xff]   ;;  %v1234_v21 = vld [vmem:[#allocation5 + $0xd0] sm:$0xff]  }
  0x3a   :  { %1054 = vmatpush3.bf16.msra.mxu0 %v1219_v6  ;;  %v1228_v15 = vld [vmem:[#allocation5 + $0xa0] sm:$0xff]   ;;  %v1232_v19 = vld [vmem:[#allocation5 + $0x98] sm:$0xff]   ;;  %v1235_v22 = vld [vmem:[#allocation5 + $0x10] sm:$0xff]  }
  0x3b   :  { %1076 = vmatpush3.bf16.msra.mxu1 %v1220_v7  ;;  %1055 = vmatprep.subr.bf16.mxu0 %v1221_v8  ;;  %v1236_v23 = vld [vmem:[#allocation5 + $0x90] sm:$0xff]   ;;  %v1237_v24 = vld [vmem:[#allocation5 + $0x48] sm:$0xff]   ;;  %v1241_v28 = vld [vmem:[#allocation5 + $0x40] sm:$0xff]  }
  0x3c   :  { %1077 = vmatprep.subr.bf16.mxu1 %v1222_v9  ;;  %v1238_v25 = vld [vmem:[#allocation5 + $0xc8] sm:$0xff]   ;;  %v1242_v29 = vld [vmem:[#allocation5 + $0xc0] sm:$0xff]   ;;  %v1249_v38 = vld [vmem:[#allocation5 + $0x178] sm:$0xff]  }
  0x3d   :  { %v1239_v26 = vld [vmem:[#allocation5 + $0x8] sm:$0xff]   ;;  %v1243_v30 = vld [vmem:[#allocation5] sm:$0xff]   ;;  %v1250_v40 = vld [vmem:[#allocation5 + $0x138] sm:$0xff]  }
  0x3e   :  { %1056 = vmatpush3.bf16.msra.mxu0 %v1223_v10  ;;  %v1240_v27 = vld [vmem:[#allocation5 + $0x88] sm:$0xff]   ;;  %v1244_v31 = vld [vmem:[#allocation5 + $0x80] sm:$0xff]   ;;  %v1251_v41 = vld [vmem:[#allocation5 + $0x1b8] sm:$0xff]  }
  0x3f   :  { %1078 = vmatpush3.bf16.msra.mxu1 %v1224_v11  ;;  %1057 = vmatprep.subr.bf16.mxu0 %v1225_v12  ;;  %v81_v32 = vld [vmem:[#allocation2] sm:$0xff]  ;;  %v82_v33 = vld [vmem:[#allocation2 + $0x8] sm:$0xff]  ;;  %v1261_v51 = vld [vmem:[#allocation5 + $0x158] sm:$0xff]  }
  0x40   :  { %1079 = vmatprep.subr.bf16.mxu1 %v1226_v13  ;;  %v970_v34 = vcombine.low %v81_v32, %v81_v32  ;;  %v971_v35 = vcombine.high %v81_v32, %v81_v32  ;;  %v972_v36 = vcombine.low %v82_v33, %v82_v33  ;;  %v973_v37 = vcombine.high %v82_v33, %v82_v33  ;;  %v1252_v42 = vld [vmem:[#allocation5 + $0x170] sm:$0xff]   ;;  %v1255_v45 = vld [vmem:[#allocation5 + $0x168] sm:$0xff]   ;;  %v1258_v48 = vld [vmem:[#allocation5 + $0x160] sm:$0xff]  }
  0x41   :  { %v1253_v43 = vld [vmem:[#allocation5 + $0x130] sm:$0xff]   ;;  %v1256_v46 = vld [vmem:[#allocation5 + $0x128] sm:$0xff]   ;;  %v1259_v49 = vld [vmem:[#allocation5 + $0x120] sm:$0xff]  }
  0x42   :  { %1058 = vmatpush3.bf16.msra.mxu0 %v1227_v14  ;;  %597 = vmatprep.mubr.bf16.mxu0 %v971_v35  ;;  %v1254_v44 = vld [vmem:[#allocation5 + $0x1b0] sm:$0xff]   ;;  %v1257_v47 = vld [vmem:[#allocation5 + $0x1a8] sm:$0xff]   ;;  %v1260_v50 = vld [vmem:[#allocation5 + $0x1a0] sm:$0xff]  }
  0x43   :  { %1080 = vmatpush3.bf16.msra.mxu1 %v1228_v15  ;;  %1059 = vmatprep.subr.bf16.mxu0 %v1229_v16  ;;  %v1262_v52 = vld [vmem:[#allocation5 + $0x118] sm:$0xff]   ;;  %v1264_v54 = vld [vmem:[#allocation5 + $0x150] sm:$0xff]   ;;  %v1267_v57 = vld [vmem:[#allocation5 + $0x148] sm:$0xff]  }
  0x44   :  { %1081 = vmatprep.subr.bf16.mxu1 %v1230_v17  ;;  %637 = vmatprep.mubr.bf16.mxu1 %v973_v37  ;;  %v1263_v53 = vld [vmem:[#allocation5 + $0x198] sm:$0xff]   ;;  %v1265_v55 = vld [vmem:[#allocation5 + $0x110] sm:$0xff]   ;;  %v1268_v58 = vld [vmem:[#allocation5 + $0x108] sm:$0xff]  }
  0x45   :  { %v1266_v56 = vld [vmem:[#allocation5 + $0x190] sm:$0xff]   ;;  %v1269_v59 = vld [vmem:[#allocation5 + $0x188] sm:$0xff]   ;;  %v1270_v61 = vld [vmem:[#allocation5 + $0x140] sm:$0xff]  }
  0x46   :  { %1060 = vmatpush3.bf16.msra.mxu0 %v1231_v18  ;;  %v83_v60 = vld [vmem:[#allocation2 + $0x10] sm:$0xff]  ;;  %v1271_v63 = vld [vmem:[#allocation5 + $0x100] sm:$0xff]   ;;  %v1275_v1 = vld [vmem:[#allocation2 + $0x18] ss:$0 sps:$4 sm:$0xff]  }
  0x47   :  { %1082 = vmatpush3.bf16.msra.mxu1 %v1232_v19  ;;  %1061 = vmatprep.subr.bf16.mxu0 %v1233_v20  ;;  %v975_v62 = vcombine.high %v83_v60, %v83_v60  ;;  %v1272_v0 = vld [vmem:[#allocation5 + $0x180] sm:$0xff]   ;;  %v974_v2 = vcombine.low %v83_v60, %v83_v60  ;;  %v1276_v3 = vld [vmem:[#allocation7 + $0x38] sm:$0xff]   ;;  %v1277_v4 = vld [vmem:[#allocation7 + $0x30] sm:$0xff]  }
  0x48   :  { %1083 = vmatprep.subr.bf16.mxu1 %v1234_v21  ;;  %v1278_v5 = vld [vmem:[#allocation7 + $0x28] sm:$0xff]   ;;  %v1279_v6 = vld [vmem:[#allocation7 + $0x20] sm:$0xff]   ;;  %v1280_v7 = vld [vmem:[#allocation7 + $0x18] sm:$0xff]  }
  0x49   :  { %v1281_v8 = vld [vmem:[#allocation7 + $0x10] sm:$0xff]   ;;  %v1282_v9 = vld [vmem:[#allocation7 + $0x8] sm:$0xff]   ;;  %v1283_v10 = vld [vmem:[#allocation7] sm:$0xff]  }
  0x4a   :  { %1062 = vmatpush3.bf16.msra.mxu0 %v1235_v22  ;;  %v1284_v11 = vld [vmem:[#allocation8 + $0x38] sm:$0xff]   ;;  %v1285_v12 = vld [vmem:[#allocation8 + $0x30] sm:$0xff]   ;;  %v1286_v13 = vld [vmem:[#allocation8 + $0x28] sm:$0xff]  }
  0x4b   :  { %1084 = vmatpush3.bf16.msra.mxu1 %v1236_v23  ;;  %1063 = vmatprep.subr.bf16.mxu0 %v1237_v24  ;;  %v1287_v14 = vld [vmem:[#allocation8 + $0x20] sm:$0xff]   ;;  %v1288_v15 = vld [vmem:[#allocation8 + $0x18] sm:$0xff]   ;;  %v1289_v16 = vld [vmem:[#allocation8 + $0x10] sm:$0xff]  }
  0x4c   :  { %1085 = vmatprep.subr.bf16.mxu1 %v1238_v25 }
  0x4e   :  { %1064 = vmatpush3.bf16.msra.mxu0 %v1239_v26  ;;  %v969_v26 = vld [vmem:[%s1514_s2] ss:$0 sm:$0xff] }
  0x4f   :  { %1086 = vmatpush3.bf16.msra.mxu1 %v1240_v27  ;;  %1065 = vmatprep.subr.bf16.mxu0 %v1241_v28 }
  0x50   :  { %1087 = vmatprep.subr.bf16.mxu1 %v1242_v29 }
  0x52   :  { %1066 = vmatpush3.bf16.msra.mxu0 %v1243_v30 }
  0x53   :  { %1088 = vmatpush3.bf16.msra.mxu1 %v1244_v31  ;;  %1095 = vmatprep.subr.bf16.mxu0 %v1249_v38 }
  0x54   :  { %1144 = vmatprep.subr.bf16.mxu1 %v1406_v39 }
  0x55   :  { %598 = vmatmul.mubr.bf16.vlgmr.msra.gmra.mxu0 %v970_v34 }
  0x56   :  { %638 = vmatmul.mubr.bf16.vlgmr.msra.gmra.mxu1 %v972_v36  ;;  %1096 = vmatpush3.bf16.msra.mxu0 %v1250_v40 }
  0x57   :  { %1145 = vmatpush3.bf16.msra.mxu1 %v1251_v41  ;;  %1097 = vmatprep.subr.bf16.mxu0 %v1252_v42 }
  0x58   :  { %1146 = vmatprep.subr.bf16.mxu1 %v1406_v39  ;;  %1160 = vmatprep.mubr.msk.bf16.mxu1 %vm1407_vm0, %v1406_v39 }
  0x59   :  { %677 = vmatprep.mubr.bf16.mxu0 %v975_v62 }
  0x5a   :  { %1098 = vmatpush3.bf16.msra.mxu0 %v1253_v43 }
  0x5b   :  { %1147 = vmatpush3.bf16.msra.mxu1 %v1254_v44  ;;  %1099 = vmatprep.subr.bf16.mxu0 %v1255_v45  ;;  %v1290_v44 = vld [vmem:[#allocation8 + $0x8] sm:$0xff]   ;;  %v1291_v45 = vld [vmem:[#allocation8] sm:$0xff]  }
  0x5c   :  { %1148 = vmatprep.subr.bf16.mxu1 %v1406_v39 }
  0x5e   :  { %1100 = vmatpush3.bf16.msra.mxu0 %v1256_v46  ;;  %v1033_v46 = vld [vmem:[%s1516_s4] ss:$0 sm:$0xff]  ;;  %s1372_s4 = scalar_lea.vmem %s959_s25, 128 }
  0x5f   :  { %1149 = vmatpush3.bf16.msra.mxu1 %v1257_v47  ;;  %1101 = vmatprep.subr.bf16.mxu0 %v1258_v48  ;;  %p1373_p6 = scmp.ne.s32.totalorder %s959_s25, %s1372_s4  ;;  %p1378_p8 = scmp.lt.s32.totalorder %s1372_s4, %s1372_s4 }
  0x60   :  { %1150 = vmatprep.subr.bf16.mxu1 %v1406_v39 }
  0x61   :  { %p1379_p9 = por %p1378_p8, %p1377_p7 }
  0x62   :  { %1102 = vmatpush3.bf16.msra.mxu0 %v1259_v49 }
  0x63   :  { %1151 = vmatpush3.bf16.msra.mxu1 %v1260_v50  ;;  %1103 = vmatprep.subr.bf16.mxu0 %v1261_v51  ;;  %p1380_p10 = pnand %p1379_p9, %p1373_p6 }
  0x64   :  { %1152 = vmatprep.subr.bf16.mxu1 %v1406_v39 }
  0x66   :  { %1104 = vmatpush3.bf16.msra.mxu0 %v1262_v52 }
  0x67   :  { %1153 = vmatpush3.bf16.msra.mxu1 %v1263_v53  ;;  %1105 = vmatprep.subr.bf16.mxu0 %v1264_v54  ;;  %v1042_v54 = vld [vmem:[%s1518_s6] ss:$0 sm:$0xff] }
  0x68   :  { %1154 = vmatprep.subr.bf16.mxu1 %v1406_v39 }
  0x6a   :  { %1106 = vmatpush3.bf16.msra.mxu0 %v1265_v55 }
  0x6b   :  { %1155 = vmatpush3.bf16.msra.mxu1 %v1266_v56  ;;  %1107 = vmatprep.subr.bf16.mxu0 %v1267_v57 }
  0x6c   :  { %1156 = vmatprep.subr.bf16.mxu1 %v1406_v39 }
  0x6e   :  { %1108 = vmatpush3.bf16.msra.mxu0 %v1268_v58 }
  0x6f   :  { %1157 = vmatpush3.bf16.msra.mxu1 %v1269_v59  ;;  %1109 = vmatprep.subr.bf16.mxu0 %v1270_v61 }
  0x70   :  { %1158 = vmatprep.subr.bf16.mxu1 %v1406_v39 }
  0x72   :  { %1110 = vmatpush3.bf16.msra.mxu0 %v1271_v63 }
  0x73   :  { %1159 = vmatpush3.bf16.msra.mxu1 %v1272_v0  ;;  %1164 = vmatprep.subr.bf16.mxu0 %v1406_v39 }
  0x74   :  { %1184 = vmatprep.subr.bf16.mxu1 %v1406_v39 }
  0x75   :  { %678 = vmatmul.mubr.bf16.vlgmr.msra.gmra.mxu0 %v974_v2 }
  0x76   :  { %1161 = vmatmul.mubr.bf16.vlgmr.msra.gmra.mxu1 %v1275_v1  ;;  %1180 = vmatprep.mubr.msk.bf16.mxu0 %vm1407_vm0, %v1406_v39 }
  0x77   :  { %1200 = vmatprep.mubr.msk.bf16.mxu1 %vm1407_vm0, %v1406_v39  ;;  %1165 = vmatpush3.bf16.msra.mxu0 %v1276_v3 }
  0x78   :  { %1166 = vmatprep.subr.bf16.mxu0 %v1406_v39  ;;  %1185 = vmatpush3.bf16.msra.mxu1 %v1284_v11 }
  0x79   :  { %1186 = vmatprep.subr.bf16.mxu1 %v1406_v39 }
  0x7b   :  { %1167 = vmatpush3.bf16.msra.mxu0 %v1277_v4 }
  0x7c   :  { %1168 = vmatprep.subr.bf16.mxu0 %v1406_v39  ;;  %1187 = vmatpush3.bf16.msra.mxu1 %v1285_v12 }
  0x7d   :  { %1188 = vmatprep.subr.bf16.mxu1 %v1406_v39 }
  0x7f   :  { %1169 = vmatpush3.bf16.msra.mxu0 %v1278_v5 }
  0x80   :  { %1170 = vmatprep.subr.bf16.mxu0 %v1406_v39  ;;  %1189 = vmatpush3.bf16.msra.mxu1 %v1286_v13 }
  0x81   :  { %1190 = vmatprep.subr.bf16.mxu1 %v1406_v39 }
  0x83   :  { %1171 = vmatpush3.bf16.msra.mxu0 %v1279_v6 }
  0x84   :  { %1172 = vmatprep.subr.bf16.mxu0 %v1406_v39  ;;  %1191 = vmatpush3.bf16.msra.mxu1 %v1287_v14 }
  0x85   :  { %1192 = vmatprep.subr.bf16.mxu1 %v1406_v39 }
  0x87   :  { %1173 = vmatpush3.bf16.msra.mxu0 %v1280_v7 }
  0x88   :  { %1174 = vmatprep.subr.bf16.mxu0 %v1406_v39  ;;  %1193 = vmatpush3.bf16.msra.mxu1 %v1288_v15 }
  0x89   :  { %1194 = vmatprep.subr.bf16.mxu1 %v1406_v39 }
  0x8b   :  { %1175 = vmatpush3.bf16.msra.mxu0 %v1281_v8 }
  0x8c   :  { %1176 = vmatprep.subr.bf16.mxu0 %v1406_v39  ;;  %1195 = vmatpush3.bf16.msra.mxu1 %v1289_v16 }
  0x8d   :  { %1196 = vmatprep.subr.bf16.mxu1 %v1406_v39 }
  0x8f   :  { %1177 = vmatpush3.bf16.msra.mxu0 %v1282_v9 }
  0x90   :  { %1178 = vmatprep.subr.bf16.mxu0 %v1406_v39  ;;  %1197 = vmatpush3.bf16.msra.mxu1 %v1290_v44 }
  0x91   :  { %1198 = vmatprep.subr.bf16.mxu1 %v1406_v39 }
  0x93   :  { %1179 = vmatpush3.bf16.msra.mxu0 %v1283_v10 }
  0x94   :  { %1199 = vmatpush3.bf16.msra.mxu1 %v1291_v45 }
 0x115   :  { %v1067_v17 = vpop.f32.mrf.mxu0 }
 0x116   :  { %v1089_v18 = vpop.f32.mrf.mxu1 }
 0x117   :  { %v1068_v19 = vpop.f32.mrf.mxu0 }
 0x118   :  { %v1090_v20 = vpop.f32.mrf.mxu1  ;;  %v1069_v25 = vadd.f32 %v1068_v19, %v1067_v17 }
 0x119   :  { %v1070_v21 = vpop.f32.mrf.mxu0  ;;  %v1091_v28 = vadd.f32 %v1090_v20, %v1089_v18 }
 0x11a   :  { %v1092_v22 = vpop.f32.mrf.mxu1  ;;  %v600_v27 = vadd.f32 %v1069_v25, %v969_v26 }
 0x11b   :  { %v1071_v23 = vpop.f32.mrf.mxu0 }
 0x11c   :  { %v1093_v24 = vpop.f32.mrf.mxu1  ;;  %v640_v32 = vadd.f32 %v1091_v28, %v600_v27 }
 0x135   :  { %v1111_v29 = vpop.f32.mrf.mxu0 }
 0x136   :  { %v719_v30 = vpop.f32.mrf.mxu1 }
 0x137   :  { %v1112_v31 = vpop.f32.mrf.mxu0 }
 0x138   :  { %v1113_v33 = vadd.f32 %v1112_v31, %v1111_v29  ;;  %v1162_v34 = vpop.f32.mrf.mxu1 }
 0x139   :  { %v1114_v35 = vpop.f32.mrf.mxu0 }
 0x13a   :  { %v680_v36 = vadd.f32 %v1113_v33, %v640_v32  ;;  %v722_v37 = vpop.f32.mrf.mxu1 }
 0x13b   :  { %v1115_v38 = vpop.f32.mrf.mxu0 }
 0x13c   :  { %v720_v40 = vadd.f32 %v719_v30, %v680_v36  ;;  %v1163_v41 = vpop.f32.mrf.mxu1 }
 0x13e   :  { %v725_v42 = vmax.f32 %v720_v40, 0.0 }
 0x140   :  { %v726_v43 = vpack.c.bf16 %v725_v42, %v725_v42 }
 0x142   :  { %1181 = vmatmul.mubr.bf16.vlgmr.msra.gmra.mxu0 %v726_v43 }
 0x202   :  { %v832_v47 = vpop.f32.mrf.mxu0 }
 0x203   :  { %v833_v48 = vadd.f32 %v1033_v46, %v832_v47 }
 0x204   :  { %v1182_v49 = vpop.f32.mrf.mxu0 }
 0x205   :  { %v838_v50 = vmax.f32 %v833_v48, 0.0 }
 0x206   :  { %v835_v51 = vpop.f32.mrf.mxu0 }
 0x207   :  { %v839_v52 = vpack.c.bf16 %v838_v50, %v838_v50 }
 0x208   :  { %v1183_v53 = vpop.f32.mrf.mxu0 }
 0x209   :  { %1201 = vmatmul.mubr.bf16.vlgmr.msra.gmra.mxu1 %v839_v52 }
 0x2c9   :  { %v945_v39 = vpop.f32.mrf.mxu1 }
 0x2ca   :  { %v946_v55 = vadd.f32 %v1042_v54, %v945_v39 }
 0x2cb   :  { %v1202_v56 = vpop.f32.mrf.mxu1 }
 0x2cc   :  { %951 = vst [vmem:[#allocation10] sm:$0xff] %v946_v55 }
 0x2cd   :  { %v948_v57 = vpop.f32.mrf.mxu1 }
 0x2ce   :  { %1383 = shalt.err (!%p1380_p10)
}
 0x2cf   :  { %961 = dma.vmem_to_hbm [thread:$0]  %s959_s25, 128, %s1519_s7, [#allocation4]   ;;  %v1203_v58 = vpop.f32.mrf.mxu1 }
 0x2d0   :  { %1398 = dma.done.wait [#allocation4], 128  }
 0x2d1   :  { %1399 = vsyncadd [#allocation4], 4294967168 }
 0x2d2   :  { %965 = vsyncpa [#allocation3], 1 }
 0x2d3   :  { %966 = vsyncpa [#allocation6], 1 }
 0x2d4   :  { %967 = vsyncpa [#allocation9], 1 }
 0x2d5   :  { %968 = vsyncpa [#allocation4], 1 }

</bundles_post_ra>
